<compile_context>
chip_gen: v7x
topology: tpu7x:2x2x1
jax: 0.10.0
libtpu: 0.0.40
codegen_flags: <defaults>
</compile_context>

<pallas_src>
import functools

import jax
import jax.numpy as jnp
from jax.experimental import pallas as pl
from jax.experimental.pallas import tpu as pltpu

_LANE = 128
_SUBLANE = 8


def _round_up(x, m):
    return (x + m - 1) // m * m


# ----------------------------------------------------------------------------
# Kernel 1: hash head (Linear -> GELU -> Linear) + per-tile BN partial stats
# ----------------------------------------------------------------------------
def _mlp_stats_kernel(x_ref, w1_ref, b1_ref, w2_ref, b2_ref,
                      full_ref, stats_ref, *, batch, tile_b, n_pad):
    x = x_ref[...]                                     # already matmul_dtype
    # MXU matmuls: matmul_dtype operands (bf16 default), f32 accumulation.
    h = jnp.dot(x, w1_ref[...], preferred_element_type=jnp.float32)
    h = h + b1_ref[...]                                # bias kept f32
    # Exact (erf) GELU in f32.
    h = 0.5 * h * (1.0 + jax.lax.erf(h * jnp.float32(0.7071067811865476)))
    full = jnp.dot(h.astype(w2_ref.dtype), w2_ref[...],
                   preferred_element_type=jnp.float32)
    full = full + b2_ref[...]

    # Mask padded batch rows to zero (they are sliced off in the wrapper).
    pid = pl.program_id(0)
    row = pid * tile_b + jax.lax.broadcasted_iota(jnp.int32, (tile_b, 1), 0)
    valid = row < batch
    full = jnp.where(valid, full, 0.0)
    full_ref[...] = full.astype(full_ref.dtype)

    # Two-pass per-tile stats in f32 (robust): column sum + sum of squared
    # deviations from the *tile* mean; combined across tiles via Chan's formula.
    count = jnp.maximum(jnp.minimum(batch - pid * tile_b, tile_b), 1)
    count_f = count.astype(jnp.float32)
    col_sum = jnp.sum(full, axis=0, keepdims=True)                 # [1, n_pad]
    tile_mean = col_sum / count_f
    diff = jnp.where(valid, full - tile_mean, 0.0)
    tile_m2 = jnp.sum(diff * diff, axis=0, keepdims=True)          # [1, n_pad]
    # Single lane-dense store: [sum | m2] in one [1, 2*n_pad] row.
    stats_ref[0, :, :] = jnp.concatenate([col_sum, tile_m2], axis=1)


# ----------------------------------------------------------------------------
# Kernel 2: folded BatchNorm FMA + per-bit L2 row-normalize, packed output.
# Row sum-of-squares is computed on the (otherwise idle) MXU.
# ----------------------------------------------------------------------------
def _bn_l2_kernel(full_ref, scale_ref, shift_ref, ssq_ref, cross_ref, csum_ref,
                  out_ref, *, group_pads, group_offsets, eps_norm):
    full = full_ref[...].astype(jnp.float32)           # [tile_b, n_pad]
    fsq = full * full
    # sum_j (full*scale_g + shift_g)^2  ==  fsq@scale_g^2 + full@(2*scale_g*shift_g) + sum(shift_g^2)
    sumsq = (jnp.dot(fsq, ssq_ref[...], preferred_element_type=jnp.float32)
             + jnp.dot(full, cross_ref[...], preferred_element_type=jnp.float32)
             + csum_ref[...])                          # [tile_b, ng_pad]
    # F.normalize: x / max(||x||, eps) == x * rsqrt(max(sumsq, eps^2))
    inv_norm = jax.lax.rsqrt(jnp.maximum(sumsq, eps_norm * eps_norm))
    for g, (gp, off) in enumerate(zip(group_pads, group_offsets)):
        # scale/shift are zero beyond this prefix -> y is exactly zero there,
        # identical to slicing full[:, :bit] before BN.
        y = full[:, :gp] * scale_ref[g:g + 1, :gp] + shift_ref[g:g + 1, :gp]
        out_ref[:, off:off + gp] = y * inv_norm[:, g:g + 1]


# ----------------------------------------------------------------------------
# Parameters (PyTorch default init), lane-padded copies for the kernels.
# ----------------------------------------------------------------------------
def init_params(key, feature_dim, hidden_size, bit_list):
    bit_list = sorted(bit_list)
    max_bit = bit_list[-1]
    h_pad = _round_up(hidden_size, _LANE)
    n_pad = _round_up(max_bit, _LANE)
    k1, k2, k3, k4 = jax.random.split(key, 4)
    s1 = 1.0 / jnp.sqrt(feature_dim)
    s2 = 1.0 / jnp.sqrt(hidden_size)
    w1 = jax.random.uniform(k1, (feature_dim, hidden_size), jnp.float32, -s1, s1)
    b1 = jax.random.uniform(k2, (1, hidden_size), jnp.float32, -s1, s1)
    w2 = jax.random.uniform(k3, (hidden_size, max_bit), jnp.float32, -s2, s2)
    b2 = jax.random.uniform(k4, (1, max_bit), jnp.float32, -s2, s2)
    # Zero-pad to lane multiples: padded hidden units give GELU(0)=0 and padded
    # output columns are exactly zero, so padded math == unpadded math.
    w1p = jnp.zeros((feature_dim, h_pad), jnp.float32).at[:, :hidden_size].set(w1)
    b1p = jnp.zeros((1, h_pad), jnp.float32).at[:, :hidden_size].set(b1)
    w2p = jnp.zeros((h_pad, n_pad), jnp.float32).at[:hidden_size, :max_bit].set(w2)
    b2p = jnp.zeros((1, n_pad), jnp.float32).at[:, :max_bit].set(b2)
    n_groups = len(bit_list)
    gamma_packed = jnp.zeros((n_groups, n_pad), jnp.float32)
    beta_packed = jnp.zeros((n_groups, n_pad), jnp.float32)
    for i, b in enumerate(bit_list):
        gamma_packed = gamma_packed.at[i, :b].set(1.0)   # BatchNorm1d weight=1
        # beta stays 0 (BatchNorm1d default bias=0)
    return {
        "bit_list": bit_list,
        "w1": w1, "b1": b1, "w2": w2, "b2": b2,
        "w1p": w1p, "b1p": b1p, "w2p": w2p, "b2p": b2p,
        "bn_gamma": [jnp.ones((1, b), jnp.float32) for b in bit_list],
        "bn_beta": [jnp.zeros((1, b), jnp.float32) for b in bit_list],
        "bn_gamma_packed": gamma_packed,
        "bn_beta_packed": beta_packed,
    }


# ----------------------------------------------------------------------------
# Forward
# ----------------------------------------------------------------------------
def nested_hash_layer_forward(params, x, *, matmul_dtype=jnp.bfloat16,
                              tile_b=None):
    bit_list = params["bit_list"]
    n_groups = len(bit_list)
    w1p, b1p, w2p, b2p = params["w1p"], params["b1p"], params["w2p"], params["b2p"]
    gamma_p, beta_p = params["bn_gamma_packed"], params["bn_beta_packed"]

    batch, feat = x.shape
    h_pad = w1p.shape[1]
    n_pad = w2p.shape[1]
    mm_bytes = jnp.dtype(matmul_dtype).itemsize

    # Per-group lane-dense packing (each group padded only to its own 128-mult).
    group_pads = tuple(_round_up(b, _LANE) for b in bit_list)
    group_offsets, off = [], 0
    for gp in group_pads:
        group_offsets.append(off)
        off += gp
    group_offsets = tuple(group_offsets)
    total_pack = off
    ng_pad = _round_up(n_groups, _LANE)

    # ---- tile_b from an explicit VMEM budget (double-buffered blocks + live) ----
    def _vmem_estimate(tb):
        k1 = (2 * (feat * h_pad + h_pad * n_pad) * mm_bytes        # weights (2x buf)
              + 2 * (h_pad + n_pad) * 4                            # biases
              + 2 * tb * feat * mm_bytes                           # x tile
              + 2 * tb * n_pad * mm_bytes                          # full out tile
              + 2 * 2 * n_pad * 4                                  # stats out
              + tb * (h_pad + 2 * n_pad) * 4)                      # live f32 values
        k2 = (2 * tb * n_pad * mm_bytes                            # full in tile
              + 2 * tb * total_pack * 4                            # packed out tile
              + 2 * (2 * n_groups * n_pad + 2 * n_pad * ng_pad + ng_pad) * 4
              + tb * 3 * n_pad * 4)                                # live f32 values
        return max(k1, k2)

    b8 = _round_up(batch, _SUBLANE)
    if tile_b is None:
        budget = 44 << 20        # safe within v7x's 64 MiB VMEM per TC
        cands = sorted({min(b8, 1024), 512, 384, 256, 128, 64, 32, 16, 8})
        cands = [c for c in cands if c <= b8][::-1]
        tile_b = next((c for c in cands if _vmem_estimate(c) <= budget), _SUBLANE)
    else:
        tile_b = max(_SUBLANE, _round_up(min(tile_b, b8), _SUBLANE))
    batch_pad = _round_up(batch, tile_b)
    num_tiles = batch_pad // tile_b
    vmem_limit = int(min(60 << 20, max(32 << 20, _vmem_estimate(tile_b) + (6 << 20))))
    cparams = pltpu.CompilerParams(dimension_semantics=("parallel",),
                                   vmem_limit_bytes=vmem_limit)

    # Pre-cast x and weights to matmul_dtype in the wrapper (no in-kernel casts,
    # half the weight/activation DMA bytes when bf16).
    xp = x if batch_pad == batch else jnp.pad(x, ((0, batch_pad - batch), (0, 0)))
    xp = xp.astype(matmul_dtype)
    w1c = w1p.astype(matmul_dtype)
    w2c = w2p.astype(matmul_dtype)

    # ---------------- Kernel 1: MLP + per-tile BN partial stats --------------
    mlp_kernel = functools.partial(_mlp_stats_kernel, batch=batch,
                                   tile_b=tile_b, n_pad=n_pad)
    mlp_cost = pl.CostEstimate(
        flops=2 * batch_pad * feat * h_pad + 2 * batch_pad * h_pad * n_pad,
        transcendentals=batch_pad * h_pad,
        bytes_accessed=(mm_bytes * (batch_pad * feat + feat * h_pad
                                    + h_pad * n_pad + batch_pad * n_pad)
                        + 4 * (h_pad + n_pad + num_tiles * 2 * n_pad)),
    )
    full, stats = pl.pallas_call(
        mlp_kernel,
        out_shape=(jax.ShapeDtypeStruct((batch_pad, n_pad), matmul_dtype),
                   jax.ShapeDtypeStruct((num_tiles, 1, 2 * n_pad), jnp.float32)),
        grid=(num_tiles,),
        in_specs=[
            pl.BlockSpec((tile_b, feat), lambda i: (i, 0)),
            pl.BlockSpec((feat, h_pad), lambda i: (0, 0)),
            pl.BlockSpec((1, h_pad), lambda i: (0, 0)),
            pl.BlockSpec((h_pad, n_pad), lambda i: (0, 0)),
            pl.BlockSpec((1, n_pad), lambda i: (0, 0)),
        ],
        out_specs=(
            pl.BlockSpec((tile_b, n_pad), lambda i: (i, 0)),
            pl.BlockSpec((1, 1, 2 * n_pad), lambda i: (i, 0, 0)),
        ),
        compiler_params=cparams,
        cost_estimate=mlp_cost,
    )(xp, w1c, b1p, w2c, b2p)

    # ---- tiny XLA combine: Chan parallel-variance across tiles (exact, stable) ----
    stats2 = stats[:, 0, :]                                  # [num_tiles, 2*n_pad]
    tile_sum = stats2[:, :n_pad]
    tile_m2 = stats2[:, n_pad:]
    counts = jnp.maximum(
        jnp.minimum(float(tile_b),
                    float(batch) - jnp.arange(num_tiles, dtype=jnp.float32) * float(tile_b)),
        1.0)                                                  # [num_tiles]
    tile_mean = tile_sum / counts[:, None]
    mean = jnp.sum(tile_sum, axis=0, keepdims=True) / float(batch)          # [1, n_pad]
    var = (jnp.sum(tile_m2, axis=0, keepdims=True)
           + jnp.sum(counts[:, None] * jnp.square(tile_mean - mean),
                     axis=0, keepdims=True)) / float(batch)
    var = jnp.maximum(var, 0.0)                               # biased var (training BN)

    # Fold BN into one FMA per group, and precompute MXU sum-of-squares constants.
    scale = gamma_p * jax.lax.rsqrt(var + 1e-5)               # [n_groups, n_pad]
    shift = beta_p - mean * scale                             # [n_groups, n_pad]
    ssq_t = jnp.zeros((n_pad, ng_pad), jnp.float32).at[:, :n_groups].set(
        jnp.transpose(scale * scale))
    cross_t = jnp.zeros((n_pad, ng_pad), jnp.float32).at[:, :n_groups].set(
        jnp.transpose(2.0 * scale * shift))
    csum = jnp.zeros((1, ng_pad), jnp.float32).at[:, :n_groups].set(
        jnp.sum(shift * shift, axis=1)[None, :])

    # ---------------- Kernel 2: BN FMA + per-bit L2, packed lane-dense output ----
    bn_kernel = functools.partial(_bn_l2_kernel, group_pads=group_pads,
                                  group_offsets=group_offsets, eps_norm=1e-12)
    bn_cost = pl.CostEstimate(
        flops=batch_pad * (4 * n_pad * ng_pad + 4 * total_pack + 2 * n_pad),
        transcendentals=batch_pad * ng_pad,
        bytes_accessed=(mm_bytes * batch_pad * n_pad + 4 * batch_pad * total_pack
                        + 4 * (2 * n_groups * n_pad + 2 * n_pad * ng_pad + ng_pad)),
    )
    packed = pl.pallas_call(
        bn_kernel,
        out_shape=jax.ShapeDtypeStruct((batch_pad, total_pack), jnp.float32),
        grid=(num_tiles,),
        in_specs=[
            pl.BlockSpec((tile_b, n_pad), lambda i: (i, 0)),
            pl.BlockSpec((n_groups, n_pad), lambda i: (0, 0)),
            pl.BlockSpec((n_groups, n_pad), lambda i: (0, 0)),
            pl.BlockSpec((n_pad, ng_pad), lambda i: (0, 0)),
            pl.BlockSpec((n_pad, ng_pad), lambda i: (0, 0)),
            pl.BlockSpec((1, ng_pad), lambda i: (0, 0)),
        ],
        out_specs=pl.BlockSpec((tile_b, total_pack), lambda i: (i, 0)),
        compiler_params=cparams,
        cost_estimate=bn_cost,
    )(full, scale, shift, ssq_t, cross_t, csum)

    # Slice the packed lane-dense slab back into the per-bit outputs.
    # TODO(synk): downstream consumers that accept the packed layout can skip this.
    return [packed[:batch, group_offsets[i]:group_offsets[i] + bit]
            for i, bit in enumerate(bit_list)]


# ----------------------------------------------------------------------------
# Reference (plain JAX, PyTorch training-mode semantics) for sanity checks.
# `full_store_dtype` mirrors the kernel's stored-intermediate precision.
# ----------------------------------------------------------------------------
def reference_forward(params, x, matmul_dtype=jnp.float32,
                      full_store_dtype=jnp.float32):
    w1, b1, w2, b2 = params["w1"], params["b1"], params["w2"], params["b2"]
    h = jnp.dot(x.astype(matmul_dtype), w1.astype(matmul_dtype),
                preferred_element_type=jnp.float32) + b1
    h = 0.5 * h * (1.0 + jax.lax.erf(h / jnp.sqrt(2.0)))
    full = jnp.dot(h.astype(matmul_dtype), w2.astype(matmul_dtype),
                   preferred_element_type=jnp.float32) + b2
    mean = full.mean(axis=0, keepdims=True)
    var = ((full - mean) ** 2).mean(axis=0, keepdims=True)
    full_used = full.astype(full_store_dtype).astype(jnp.float32)
    outs = []
    for i, b in enumerate(params["bit_list"]):
        s = full_used[:, :b]
        xhat = ((s - mean[:, :b]) / jnp.sqrt(var[:, :b] + 1e-5)
                * params["bn_gamma"][i] + params["bn_beta"][i])
        norm = jnp.sqrt((xhat ** 2).sum(axis=1, keepdims=True))
        outs.append(xhat / jnp.maximum(norm, 1e-12))
    return outs


if __name__ == "__main__":
    feature_dim = 32
    hidden_size = 64
    bit_list = [8, 16, 32]

    key = jax.random.PRNGKey(0)
    kp, kx1, kx2 = jax.random.split(key, 3)
    params = init_params(kp, feature_dim, hidden_size, bit_list)

    # Test 1: f32 operands + f32 intermediate — bit-faithful to the PyTorch forward.
    x1 = jax.random.normal(kx1, (8, feature_dim), jnp.float32)
    outs = jax.block_until_ready(
        nested_hash_layer_forward(params, x1, matmul_dtype=jnp.float32))
    refs = reference_forward(params, x1, jnp.float32, jnp.float32)
    for o, r in zip(outs, refs):
        assert o.shape == r.shape, (o.shape, r.shape)
        err = float(jnp.abs(o - r).max())
        assert err < 1e-3, err

    # Test 2: default bf16 MXU path, multi-tile batch with a ragged last tile
    # (exercises the Chan variance combine and the padded-row masking).
    x2 = jax.random.normal(kx2, (20, feature_dim), jnp.float32)
    outs = jax.block_until_ready(
        nested_hash_layer_forward(params, x2, tile_b=8))
    refs = reference_forward(params, x2, jnp.bfloat16, jnp.bfloat16)
    for o, r in zip(outs, refs):
        assert o.shape == r.shape, (o.shape, r.shape)
        err = float(jnp.abs(o - r).max())
        assert err < 5e-3, err

    # TODO(synk): BatchNorm running_mean/running_var buffer updates are not
    # materialized (outputs use batch statistics, matching training-mode forward).
    print("KERNEL_OK")
</pallas_src>

<mosaic_0001>
module attributes {stable_mosaic.version = 11 : i64} {
  func.func @_mlp_stats_kernel(%arg0: i32, %arg1: memref<8x32xf32, #tpu.memory_space<vmem>>, %arg2: memref<32x128xf32, #tpu.memory_space<vmem>>, %arg3: memref<1x128xf32, #tpu.memory_space<vmem>>, %arg4: memref<128x128xf32, #tpu.memory_space<vmem>>, %arg5: memref<1x128xf32, #tpu.memory_space<vmem>>, %arg6: memref<8x128xf32, #tpu.memory_space<vmem>>, %arg7: memref<1x1x256xf32, #tpu.memory_space<vmem>>) attributes {dimension_semantics = [#tpu.dimension_semantics<parallel>], iteration_bounds = array<i64: 1>, scalar_prefetch = 0 : i64, scratch_operands = 0 : i64, tpu.core_type = #tpu.core_type<tc>, window_params = [{transform_indices = @transform_0, window_bounds = array<i64: 8, 32>}, {pipeline_mode = #tpu.pipeline_mode<synchronous>, transform_indices = @transform_1, window_bounds = array<i64: 32, 128>}, {pipeline_mode = #tpu.pipeline_mode<synchronous>, transform_indices = @transform_2, window_bounds = array<i64: 1, 128>}, {pipeline_mode = #tpu.pipeline_mode<synchronous>, transform_indices = @transform_3, window_bounds = array<i64: 128, 128>}, {pipeline_mode = #tpu.pipeline_mode<synchronous>, transform_indices = @transform_4, window_bounds = array<i64: 1, 128>}, {transform_indices = @transform_5, window_bounds = array<i64: 8, 128>}, {transform_indices = @transform_6, window_bounds = array<i64: 1, 1, 256>}]} {
    %c0 = arith.constant 0 : index
    %c0_0 = arith.constant 0 : index
    %0 = vector.load %arg1[%c0, %c0_0] : memref<8x32xf32, #tpu.memory_space<vmem>>, vector<8x32xf32>
    %c0_1 = arith.constant 0 : index
    %c0_2 = arith.constant 0 : index
    %1 = vector.load %arg2[%c0_1, %c0_2] : memref<32x128xf32, #tpu.memory_space<vmem>>, vector<32x128xf32>
    %cst = arith.constant dense<0.000000e+00> : vector<8x128xf32>
    %2 = tpu.matmul %0, %1, %cst {dimension_numbers = #tpu.dot_dimension_numbers<[1], [0], [0], [1], [0, 0, 1, 1], [], []>} : vector<8x32xf32>, vector<32x128xf32>, vector<8x128xf32> -> vector<8x128xf32>
    %c0_3 = arith.constant 0 : index
    %c0_4 = arith.constant 0 : index
    %3 = vector.load %arg3[%c0_3, %c0_4] : memref<1x128xf32, #tpu.memory_space<vmem>>, vector<1x128xf32>
    %4 = vector.broadcast %3 : vector<1x128xf32> to vector<8x128xf32>
    %5 = arith.addf %2, %4 : vector<8x128xf32>
    %cst_5 = arith.constant 5.000000e-01 : f32
    %6 = vector.broadcast %cst_5 : f32 to vector<8x128xf32>
    %7 = arith.mulf %6, %5 : vector<8x128xf32>
    %cst_6 = arith.constant 0.707106769 : f32
    %8 = vector.broadcast %cst_6 : f32 to vector<8x128xf32>
    %9 = arith.mulf %5, %8 : vector<8x128xf32>
    %10 = math.erf %9 : vector<8x128xf32>
    %cst_7 = arith.constant 1.000000e+00 : f32
    %11 = vector.broadcast %cst_7 : f32 to vector<8x128xf32>
    %12 = arith.addf %11, %10 : vector<8x128xf32>
    %13 = arith.mulf %7, %12 : vector<8x128xf32>
    %c0_8 = arith.constant 0 : index
    %c0_9 = arith.constant 0 : index
    %14 = vector.load %arg4[%c0_8, %c0_9] : memref<128x128xf32, #tpu.memory_space<vmem>>, vector<128x128xf32>
    %cst_10 = arith.constant dense<0.000000e+00> : vector<8x128xf32>
    %15 = tpu.matmul %13, %14, %cst_10 {dimension_numbers = #tpu.dot_dimension_numbers<[1], [0], [0], [1], [0, 0, 1, 1], [], []>} : vector<8x128xf32>, vector<128x128xf32>, vector<8x128xf32> -> vector<8x128xf32>
    %c0_11 = arith.constant 0 : index
    %c0_12 = arith.constant 0 : index
    %16 = vector.load %arg5[%c0_11, %c0_12] : memref<1x128xf32, #tpu.memory_space<vmem>>, vector<1x128xf32>
    %17 = vector.broadcast %16 : vector<1x128xf32> to vector<8x128xf32>
    %18 = arith.addf %15, %17 : vector<8x128xf32>
    %c8_i32 = arith.constant 8 : i32
    %19 = arith.muli %arg0, %c8_i32 : i32
    %20 = tpu.iota {dimensions = array<i32: 0>} : vector<8x1xi32>
    %21 = vector.broadcast %19 : i32 to vector<8x1xi32>
    %22 = arith.addi %21, %20 : vector<8x1xi32>
    %c8_i32_13 = arith.constant 8 : i32
    %23 = vector.broadcast %c8_i32_13 : i32 to vector<8x1xi32>
    %24 = arith.cmpi slt, %22, %23 : vector<8x1xi32>
    %cst_14 = arith.constant 0.000000e+00 : f32
    %25 = vector.shape_cast %24 : vector<8x1xi1> to vector<8x1xi1>
    %26 = vector.broadcast %25 : vector<8x1xi1> to vector<8x128xi1>
    %27 = vector.broadcast %cst_14 : f32 to vector<8x128xf32>
    %28 = arith.select %26, %18, %27 : vector<8x128xi1>, vector<8x128xf32>
    %c0_15 = arith.constant 0 : index
    %c0_16 = arith.constant 0 : index
    %29 = vector.load %arg6[%c0_15, %c0_16] : memref<8x128xf32, #tpu.memory_space<vmem>>, vector<8x128xf32>
    tpu.vector_store %arg6[%c0_15, %c0_16], %28 {strides = array<i32>} : memref<8x128xf32, #tpu.memory_space<vmem>>, vector<8x128xf32>,
    %c8_i32_17 = arith.constant 8 : i32
    %30 = arith.muli %arg0, %c8_i32_17 : i32
    %c8_i32_18 = arith.constant 8 : i32
    %31 = arith.subi %c8_i32_18, %30 : i32
    %c8_i32_19 = arith.constant 8 : i32
    %32 = arith.minsi %31, %c8_i32_19 : i32
    %c1_i32 = arith.constant 1 : i32
    %33 = arith.maxsi %32, %c1_i32 : i32
    %34 = arith.sitofp %33 : i32 to f32
    %cst_20 = arith.constant dense<0.000000e+00> : vector<128xf32>
    %35 = vector.multi_reduction <add>, %28, %cst_20 [0] : vector<8x128xf32> to vector<128xf32>
    %36 = vector.shape_cast %35 : vector<128xf32> to vector<1x128xf32>
    %37 = vector.broadcast %34 : f32 to vector<1x128xf32>
    %38 = arith.divf %36, %37 : vector<1x128xf32>
    %39 = vector.broadcast %38 : vector<1x128xf32> to vector<8x128xf32>
    %40 = arith.subf %28, %39 : vector<8x128xf32>
    %cst_21 = arith.constant 0.000000e+00 : f32
    %41 = vector.shape_cast %24 : vector<8x1xi1> to vector<8x1xi1>
    %42 = vector.broadcast %41 : vector<8x1xi1> to vector<8x128xi1>
    %43 = vector.broadcast %cst_21 : f32 to vector<8x128xf32>
    %44 = arith.select %42, %40, %43 : vector<8x128xi1>, vector<8x128xf32>
    %45 = arith.mulf %44, %44 : vector<8x128xf32>
    %cst_22 = arith.constant dense<0.000000e+00> : vector<128xf32>
    %46 = vector.multi_reduction <add>, %45, %cst_22 [0] : vector<8x128xf32> to vector<128xf32>
    %47 = vector.shape_cast %46 : vector<128xf32> to vector<1x128xf32>
    %48 = tpu.concatenate %36, %47 in 1 : vector<1x128xf32>, vector<1x128xf32> -> vector<1x256xf32>
    %c0_23 = arith.constant 0 : index
    %c0_24 = arith.constant 0 : index
    %c0_25 = arith.constant 0 : index
    %49 = vector.load %arg7[%c0_23, %c0_24, %c0_25] : memref<1x1x256xf32, #tpu.memory_space<vmem>>, vector<1x1x256xf32>
    %50 = vector.shape_cast %49 : vector<1x1x256xf32> to vector<1x256xf32>
    %51 = vector.shape_cast %48 : vector<1x256xf32> to vector<1x1x256xf32>
    tpu.vector_store %arg7[%c0_23, %c0_24, %c0_25], %51 {strides = array<i32>} : memref<1x1x256xf32, #tpu.memory_space<vmem>>, vector<1x1x256xf32>,
    return
  }
  func.func @transform_0(%arg0: i32) -> (i32, i32) {
    %c0_i32 = arith.constant 0 : i32
    %c0_i32_0 = arith.constant 0 : i32
    return %arg0, %c0_i32 : i32, i32
  }
  func.func @transform_1(%arg0: i32) -> (i32, i32) {
    %c0_i32 = arith.constant 0 : i32
    %c0_i32_0 = arith.constant 0 : i32
    %c0_i32_1 = arith.constant 0 : i32
    return %c0_i32, %c0_i32_0 : i32, i32
  }
  func.func @transform_2(%arg0: i32) -> (i32, i32) {
    %c0_i32 = arith.constant 0 : i32
    %c0_i32_0 = arith.constant 0 : i32
    %c0_i32_1 = arith.constant 0 : i32
    return %c0_i32, %c0_i32_0 : i32, i32
  }
  func.func @transform_3(%arg0: i32) -> (i32, i32) {
    %c0_i32 = arith.constant 0 : i32
    %c0_i32_0 = arith.constant 0 : i32
    %c0_i32_1 = arith.constant 0 : i32
    return %c0_i32, %c0_i32_0 : i32, i32
  }
  func.func @transform_4(%arg0: i32) -> (i32, i32) {
    %c0_i32 = arith.constant 0 : i32
    %c0_i32_0 = arith.constant 0 : i32
    %c0_i32_1 = arith.constant 0 : i32
    return %c0_i32, %c0_i32_0 : i32, i32
  }
  func.func @transform_5(%arg0: i32) -> (i32, i32) {
    %c0_i32 = arith.constant 0 : i32
    %c0_i32_0 = arith.constant 0 : i32
    return %arg0, %c0_i32 : i32, i32
  }
  func.func @transform_6(%arg0: i32) -> (i32, i32, i32) {
    %c0_i32 = arith.constant 0 : i32
    %c0_i32_0 = arith.constant 0 : i32
    %c0_i32_1 = arith.constant 0 : i32
    return %arg0, %c0_i32, %c0_i32_0 : i32, i32, i32
  }
}

</mosaic_0001>

<bundles_post_ra>
// kernel: tpu_custom_call.1
= control target key start
LH: loop header
LB: loop body
LE: loop exit
PB: predicated region body
PF: predicated region fallthrough
CT: control target
= control target key end

     0   :  { %12 = vsyncpa [#allocation3], 0  ;;  %s684_s0 = inlined_call_operand.hbm [shape: f32[8,32], index: 0, kind: input, shape index: {}]   ;;  %s685_s1 = inlined_call_operand.hbm [shape: f32[32,128], index: 1, kind: input, shape index: {}]   ;;  %s686_s2 = inlined_call_operand.vmem [shape: f32[1,128], index: 2, kind: input, shape index: {}]   ;;  %s687_s3 = inlined_call_operand.hbm [shape: f32[128,128], index: 3, kind: input, shape index: {}]   ;;  %s688_s4 = inlined_call_operand.vmem [shape: f32[1,128], index: 4, kind: input, shape index: {}]   ;;  %s689_s5 = inlined_call_operand.hbm [shape: f32[8,128], index: 5, kind: output, shape index: {0}]   ;;  %s690_s6 = inlined_call_operand.hbm [shape: f32[1,1,256], index: 6, kind: output, shape index: {1}]  }
   0x1   :  { %13 = vsyncpa [#allocation6], 0 }
   0x2   :  { %14 = vsyncpa [#allocation4], 0 }
   0x3   :  { %15 = vsyncpa [#allocation10], 0  ;;  %s566_s21 = smov [#allocation5]   ;;  %s448_s25 = scalar_lea.hbm %s685_s1, 512 }
   0x4   :  { %s31_s22 = sshll.u32 %s566_s21, 4  ;;  %p449_p0 = scmp.ne.s32.totalorder %s685_s1, %s448_s25  ;;  %s32_s22 = int_to_ptr.vmem [resolvable:$true] %s31_s22 }
   0x5   :  { %p452_p1 = scmp.lt.u32.totalorder %s448_s25, %s685_s1 }
   0x7   :  { %p454_p2 = pnand %p452_p1, %p449_p0 }
   0x9   :  { %457 = shalt.err (!%p454_p2)
}
   0xa   :  { %s458_s30 = scalar_lea.vmem %s32_s22, 512  ;;  %p463_p4 = scmp.lt.s32.totalorder %s32_s22, %s32_s22 }
   0xb   :  { %p459_p3 = scmp.ne.s32.totalorder %s32_s22, %s458_s30  ;;  %p464_p5 = scmp.lt.s32.totalorder %s458_s30, %s458_s30 }
   0xd   :  { %p465_p6 = por %p464_p5, %p463_p4 }
   0xf   :  { %p466_p7 = pnand %p465_p6, %p459_p3 }
  0x11   :  { %469 = shalt.err (!%p466_p7)
}
  0x12   :  { %s567_s7 = smov 128   ;;  %s568_s8 = smov 8  }
  0x13   :  { %37 = dma.hbm_to_vmem [thread:$0]  %s685_s1, 512, %s32_s22, [#allocation6], %s567_s7, %s567_s7, %s568_s8  }
  0x14   :  { %s569_s11 = smov [#allocation2]   ;;  %s570_s13 = smov [#allocation7]  }
  0x15   :  { %s22_s12 = sshll.u32 %s569_s11, 4  ;;  %s45_s14 = sshll.u32 %s570_s13, 4  ;;  %s23_s12 = int_to_ptr.vmem [resolvable:$true] %s22_s12  ;;  %s46_s14 = int_to_ptr.vmem [resolvable:$true] %s45_s14 }
  0x16   :  { %s470_s17 = scalar_lea.hbm %s684_s0, 128 }
  0x17   :  { %p471_p8 = scmp.ne.s32.totalorder %s684_s0, %s470_s17  ;;  %p474_p9 = scmp.lt.u32.totalorder %s470_s17, %s684_s0 }
  0x19   :  { %p476_p10 = pnand %p474_p9, %p471_p8 }
  0x1b   :  { %479 = shalt.err (!%p476_p10)
}
  0x1c   :  { %s480_s1 = scalar_lea.vmem %s23_s12, 128  ;;  %p485_p12 = scmp.lt.s32.totalorder %s23_s12, %s23_s12 }
  0x1d   :  { %p481_p11 = scmp.ne.s32.totalorder %s23_s12, %s480_s1  ;;  %p486_p13 = scmp.lt.s32.totalorder %s480_s1, %s480_s1 }
  0x1f   :  { %p487_p0 = por %p486_p13, %p485_p12 }
  0x21   :  { %p488_p1 = pnand %p487_p0, %p481_p11 }
  0x23   :  { %491 = shalt.err (!%p488_p1)
}
  0x24   :  { %25 = dma.hbm_to_vmem [thread:$0]  %s684_s0, 128, %s23_s12, [#allocation3]  }
  0x25   :  { %s492_s26 = scalar_lea.hbm %s687_s3, 2048 }
  0x26   :  { %p493_p2 = scmp.ne.s32.totalorder %s687_s3, %s492_s26  ;;  %p496_p3 = scmp.lt.u32.totalorder %s492_s26, %s687_s3 }
  0x28   :  { %p498_p4 = pnand %p496_p3, %p493_p2 }
  0x2a   :  { %501 = shalt.err (!%p498_p4)
}
  0x2b   :  { %s502_s9 = scalar_lea.vmem %s46_s14, 2048  ;;  %p507_p6 = scmp.lt.s32.totalorder %s46_s14, %s46_s14 }
  0x2c   :  { %p503_p5 = scmp.ne.s32.totalorder %s46_s14, %s502_s9  ;;  %p508_p7 = scmp.lt.s32.totalorder %s502_s9, %s502_s9 }
  0x2e   :  { %p509_p8 = por %p508_p7, %p507_p6 }
  0x30   :  { %p510_p9 = pnand %p509_p8, %p503_p5 }
  0x32   :  { %513 = shalt.err (!%p510_p9)
}
  0x33   :  { %51 = dma.hbm_to_vmem [thread:$0]  %s687_s3, 2048, %s46_s14, [#allocation6], %s567_s7, %s567_s7, %s568_s8  }
  0x34   :  { %558 = dma.done.wait [#allocation3], 128  }
  0x35   :  { %559 = vsyncadd [#allocation3], 4294967168 }
  0x36   :  { %560 = dma.done.wait [#allocation6], 2560  }
  0x37   :  { %561 = vsyncadd [#allocation6], 4294964736  ;;  %v571_v0 = vmov 0.0|0.0   ;;  %vm572_vm0 = vmmov 0   ;;  %v573_v1 = vmov 0.0   ;;  %v64_v2 = vld [vmem:[#allocation5] sm:$0xff] }
  0x38   :  { %405 = vmatprep.subr.bf16.mxu0 %v571_v0  ;;  %367 = vmatprep.mubr.msk.f32.mxu0 %vm572_vm0, %v573_v1  ;;  %v65_v3 = vld [vmem:[#allocation5 + $0x8] sm:$0xff]  ;;  %v66_v4 = vld [vmem:[#allocation5 + $0x10] sm:$0xff]  ;;  %v67_v6 = vld [vmem:[#allocation5 + $0x18] sm:$0xff]  ;;  %vm75_vm1 = vcmask 261120   ;;  %s574_s12 = smov [#allocation8]  }
  0x39   :  { %411 = vmatprep.subr.bf16.mxu1 %v571_v0  ;;  %402 = vmatprep.mubr.msk.f32.mxu1 %vm572_vm0, %v573_v1  ;;  %v406_v5 = vpack.c.bf16 %v65_v3, %v64_v2  ;;  %v154_v7 = vld [vmem:[#allocation7] sm:$0xff]  ;;  %v155_v8 = vld [vmem:[#allocation7 + $0x8] sm:$0xff]  ;;  %v156_v9 = vld [vmem:[#allocation7 + $0x10] sm:$0xff]  ;;  %v409_v11 = vpack.c.bf16 %v67_v6, %v66_v4  ;;  %s310_s13 = sshll.u32 %s574_s12, 4  ;;  %s311_s13 = int_to_ptr.vmem [resolvable:$true] %s310_s13 }
  0x3a   :  { %v157_v10 = vld [vmem:[#allocation7 + $0x18] sm:$0xff]  ;;  %v412_v12 = vpack.c.bf16 %v155_v8, %v154_v7  ;;  %v158_v14 = vld [vmem:[#allocation7 + $0x20] sm:$0xff]  ;;  %v159_v15 = vld [vmem:[#allocation7 + $0x28] sm:$0xff]  ;;  %p519_p11 = scmp.lt.s32.totalorder %s311_s13, %s311_s13 }
  0x3b   :  { %407 = vmatpush3.bf16.msra.mxu0 %v406_v5  ;;  %v415_v13 = vpack.c.bf16 %v157_v10, %v156_v9  ;;  %v63_v16 = vld [vmem:[#allocation2] sm:$0xff]  ;;  %v418_v17 = vpack.c.bf16 %v159_v15, %v158_v14  ;;  %v160_v18 = vld [vmem:[#allocation7 + $0x30] sm:$0xff]  ;;  %v162_v21 = vld [vmem:[#allocation7 + $0x40] sm:$0xff] }
  0x3c   :  { %408 = vmatprep.subr.bf16.mxu0 %v571_v0  ;;  %413 = vmatpush3.bf16.msra.mxu1 %v412_v12  ;;  %v161_v19 = vld [vmem:[#allocation7 + $0x38] sm:$0xff]  ;;  %v163_v22 = vld [vmem:[#allocation7 + $0x48] sm:$0xff]  ;;  %v164_v24 = vld [vmem:[#allocation7 + $0x50] sm:$0xff] }
  0x3d   :  { %414 = vmatprep.subr.bf16.mxu1 %v571_v0  ;;  %v421_v20 = vpack.c.bf16 %v161_v19, %v160_v18  ;;  %v424_v23 = vpack.c.bf16 %v163_v22, %v162_v21  ;;  %v165_v25 = vld [vmem:[#allocation7 + $0x58] sm:$0xff]  ;;  %v166_v27 = vld [vmem:[#allocation7 + $0x60] sm:$0xff]  ;;  %v167_v28 = vld [vmem:[#allocation7 + $0x68] sm:$0xff] }
  0x3e   :  { %v427_v26 = vpack.c.bf16 %v165_v25, %v164_v24  ;;  %v430_v29 = vpack.c.bf16 %v167_v28, %v166_v27  ;;  %v168_v30 = vld [vmem:[#allocation7 + $0x70] sm:$0xff]  ;;  %v169_v31 = vld [vmem:[#allocation7 + $0x78] sm:$0xff] }
  0x3f   :  { %410 = vmatpush3.bf16.msra.mxu0 %v409_v11  ;;  %v433_v32 = vpack.c.bf16 %v169_v31, %v168_v30  ;;  %v334_v33 = vld [vmem:[%s686_s2] ss:$0 sm:$0xff]  ;;  %s514_s2 = scalar_lea.vmem %s311_s13, 128 }
  0x40   :  { %416 = vmatpush3.bf16.msra.mxu1 %v415_v13  ;;  %v336_v42 = vld [vmem:[%s688_s4] ss:$0 sm:$0xff]  ;;  %p515_p10 = scmp.ne.s32.totalorder %s311_s13, %s514_s2  ;;  %p520_p12 = scmp.lt.s32.totalorder %s514_s2, %s514_s2 }
  0x41   :  { %417 = vmatprep.subr.bf16.mxu1 %v571_v0 }
  0x42   :  { %368 = vmatmul.mubr.msk.f32.vlgmr.msra.gmra.mrb[0].mxu0 %vm75_vm1, %v63_v16  ;;  %p521_p13 = por %p520_p12, %p519_p11 }
  0x44   :  { %419 = vmatpush3.bf16.msra.mxu1 %v418_v17  ;;  %p522_p0 = pnand %p521_p13, %p515_p10 }
  0x45   :  { %420 = vmatprep.subr.bf16.mxu1 %v571_v0 }
  0x48   :  { %422 = vmatpush3.bf16.msra.mxu1 %v421_v20 }
  0x49   :  { %423 = vmatprep.subr.bf16.mxu1 %v571_v0 }
  0x4c   :  { %425 = vmatpush3.bf16.msra.mxu1 %v424_v23 }
  0x4d   :  { %426 = vmatprep.subr.bf16.mxu1 %v571_v0 }
  0x50   :  { %428 = vmatpush3.bf16.msra.mxu1 %v427_v26 }
  0x51   :  { %429 = vmatprep.subr.bf16.mxu1 %v571_v0 }
  0x54   :  { %431 = vmatpush3.bf16.msra.mxu1 %v430_v29 }
  0x55   :  { %432 = vmatprep.subr.bf16.mxu1 %v571_v0 }
  0x58   :  { %434 = vmatpush3.bf16.msra.mxu1 %v433_v32 }
 0x115   :  { %v145_v34 = vpop.f32.mrb[0].mxu0 }
 0x116   :  { %v146_v35 = vadd.f32 %v334_v33, %v145_v34  ;;  %v369_v36 = vpop.f32.mrb[1].mxu0 }
 0x118   :  { %v150_v37 = vmul.f32 0.70710677, %v146_v35  ;;  %v149_v39 = vmul.f32 0.5, %v146_v35 }
 0x11a   :  { %446 = verf.f32 %v150_v37 }
 0x124   :  { %v447_v38 = vpop.eup %446 }
 0x125   :  { %v152_v40 = vadd.f32 1.0, %v447_v38 }
 0x127   :  { %v153_v41 = vmul.f32 %v152_v40, %v149_v39 }
 0x129   :  { %403 = vmatmul.mubr.f32.vlgmr.msra.gmra.mrb[0].mxu1 %v153_v41 }
 0x1fc   :  { %v243_v43 = vpop.f32.mrb[0].mxu1 }
 0x1fd   :  { %v244_v44 = vadd.f32 %v336_v42, %v243_v43  ;;  %v404_v45 = vpop.f32.mrb[1].mxu1 }
 0x1ff   :  { %v263_v46 = vrot.slane %v244_v44, 4  ;;  %256 = vst [vmem:[#allocation8] sm:$0xff] %v244_v44 }
 0x200   :  { %525 = shalt.err (!%p522_p0)
}
 0x201   :  { %s526_s16 = scalar_lea.hbm %s689_s5, 128 }
 0x202   :  { %p527_p1 = scmp.ne.s32.totalorder %s689_s5, %s526_s16  ;;  %p530_p2 = scmp.lt.u32.totalorder %s526_s16, %s689_s5 }
 0x204   :  { %p532_p3 = pnand %p530_p2, %p527_p1 }
 0x206   :  { %535 = shalt.err (!%p532_p3)
}
 0x207   :  { %313 = dma.vmem_to_hbm [thread:$0]  %s311_s13, 128, %s689_s5, [#allocation4]   ;;  %v264_v47 = vadd.f32 %v263_v46, %v244_v44  ;;  %v575_v57 = vmov 1966171168   ;;  %v287_v59 = vlaneseq }
 0x208   :  { %v285_v58 = vunpack.c.l.s4 %v575_v57  ;;  %s576_s5 = smov [#allocation9]  }
 0x209   :  { %v265_v48 = vrot.slane %v264_v47, 2  ;;  %v288_v63 = vshrl.u32 %v287_v59, 7  ;;  %s320_s1 = sshll.u32 %s576_s5, 4  ;;  %vm301_vm2 = vcmp.lt.s32.totalorder %v287_v59, 256  ;;  %s321_s1 = int_to_ptr.vmem [resolvable:$true] %s320_s1 }
 0x20a   :  { %v286_v62 = vunpack.c.0.s8 %v285_v58  ;;  %s536_s22 = scalar_lea.vmem %s321_s1, 32  ;;  %p541_p5 = scmp.lt.s32.totalorder %s321_s1, %s321_s1 }
 0x20b   :  { %v266_v49 = vadd.f32 %v265_v48, %v264_v47  ;;  %p537_p4 = scmp.ne.s32.totalorder %s321_s1, %s536_s22  ;;  %p542_p6 = scmp.lt.s32.totalorder %s536_s22, %s536_s22 }
 0x20c   :  { %v289_v2 = vsub.s32 %v286_v62, %v288_v63 }
 0x20d   :  { %v267_v50 = vrot.slane %v266_v49, 1  ;;  %p543_p7 = por %p542_p6, %p541_p5 }
 0x20f   :  { %v268_v51 = vadd.f32 %v267_v50, %v266_v49  ;;  %p544_p8 = pnand %p543_p7, %p537_p4 }
 0x211   :  { %v271_v52 = vmul.f32 0.125, %v268_v51 }
 0x213   :  { %v272_v53 = vsub.f32 %v244_v44, %v271_v52 }
 0x215   :  { %v274_v54 = vmul.f32 %v272_v53, %v272_v53 }
 0x217   :  { %v275_v55 = vrot.slane %v274_v54, 4 }
 0x219   :  { %v276_v56 = vadd.f32 %v275_v55, %v274_v54 }
 0x21b   :  { %v277_v60 = vrot.slane %v276_v56, 2 }
 0x21d   :  { %v278_v61 = vadd.f32 %v277_v60, %v276_v56 }
 0x21f   :  { %v279_v0 = vrot.slane %v278_v61, 1 }
 0x221   :  { %v280_v1 = vadd.f32 %v279_v0, %v278_v61 }
 0x223   :  { %v283_v3 = vcombine.low %v268_v51, %v280_v1 }
 0x225   :  { %v290_v4 = vrot.slane %v283_v3, %v289_v2 }
 0x227   :  { %v297_v5 = vrot.slane %v290_v4, %v289_v2 }
 0x229   :  { %303 = vst.msk [vmem:[#allocation9] sm:$0x3] %vm301_vm2, %v297_v5 }
 0x22a   :  { %547 = shalt.err (!%p544_p8)
}
 0x22b   :  { %s548_s25 = scalar_lea.hbm %s690_s6, 32 }
 0x22c   :  { %p549_p9 = scmp.ne.s32.totalorder %s690_s6, %s548_s25  ;;  %p552_p10 = scmp.lt.u32.totalorder %s548_s25, %s690_s6 }
 0x22e   :  { %p554_p11 = pnand %p552_p10, %p549_p9 }
 0x230   :  { %557 = shalt.err (!%p554_p11)
}
 0x231   :  { %323 = dma.vmem_to_hbm [thread:$0]  %s321_s1, 32, %s690_s6, [#allocation10]  }
 0x232   :  { %562 = dma.done.wait [#allocation4], 128  }
 0x233   :  { %563 = vsyncadd [#allocation4], 4294967168 }
 0x234   :  { %564 = dma.done.wait [#allocation10], 32  }
 0x235   :  { %565 = vsyncadd [#allocation10], 4294967264 }
 0x236   :  { %330 = vsyncpa [#allocation3], 1 }
 0x237   :  { %331 = vsyncpa [#allocation6], 1 }
 0x238   :  { %332 = vsyncpa [#allocation4], 1 }
 0x239   :  { %333 = vsyncpa [#allocation10], 1 }

</bundles_post_ra>
